<compile_context>
chip_gen: v7x
topology: tpu7x:2x2x1
jax: 0.10.0
libtpu: 0.0.40
codegen_flags: <defaults>
</compile_context>

<pallas_src>
import functools

import jax
import jax.numpy as jnp
from jax import lax
from jax.experimental import pallas as pl
from jax.experimental.pallas import tpu as pltpu

_NEG_SLOPE = 0.01  # torch.nn.functional.leaky_relu default slope


def _leaky_relu(x):
    return jnp.where(x >= 0, x, _NEG_SLOPE * x)


def _highway_kernel(x1k_ref, w_ref, x1n_ref, x2_ref, o_ref, acc_ref, *, mxu_dtype):
    k = pl.program_id(2)

    @pl.when(k == 0)
    def _():
        acc_ref[...] = jnp.zeros_like(acc_ref)

    # Linear (no bias): x1 @ W^T. W stays in PyTorch (out, in) layout; we
    # contract the last ("in") dim of both operands on the MXU.
    acc_ref[...] += lax.dot_general(
        x1k_ref[...].astype(mxu_dtype),
        w_ref[...].astype(mxu_dtype),
        dimension_numbers=(((1,), (1,)), ((), ())),
        preferred_element_type=jnp.float32,
    )

    @pl.when(k == pl.num_programs(2) - 1)
    def _():
        x1 = x1n_ref[...].astype(jnp.float32)
        x2 = x2_ref[...].astype(jnp.float32)
        gate = _leaky_relu(acc_ref[...] + 1e-08)
        # gate*x2 + (1-gate)*x1 == x1 + gate*(x2 - x1)
        out = _leaky_relu(x1 + gate * (x2 - x1))
        o_ref[...] = out.astype(o_ref.dtype)


def _pick_tile(dim, pref, align):
    """Largest multiple of `align` <= pref dividing dim; else the full dim."""
    if dim <= pref:
        return dim
    t = (pref // align) * align
    while t >= align:
        if dim % t == 0:
            return t
        t -= align
    return dim


def highway(x1, x2, w, *, tm=256, tn=256, tk=512, mxu_bf16=False):
    """Highway forward. x1, x2: (B, H); w: (H, H) PyTorch (out, in) weight."""
    B, H = x1.shape
    assert x2.shape == (B, H) and w.shape == (H, H)

    tm = _pick_tile(B, tm, 8)
    tn = _pick_tile(H, tn, 128)
    tk = _pick_tile(H, tk, 128)
    ni, nj, nk = B // tm, H // tn, H // tk

    mxu_dtype = jnp.bfloat16 if mxu_bf16 else x1.dtype
    kernel = functools.partial(_highway_kernel, mxu_dtype=mxu_dtype)

    return pl.pallas_call(
        kernel,
        out_shape=jax.ShapeDtypeStruct((B, H), x1.dtype),
        grid_spec=pltpu.PrefetchScalarGridSpec(
            num_scalar_prefetch=0,
            # N-tiles outermost (weight slab resident across the batch sweep
            # when nk == 1), batch middle, K (reduction) innermost so the f32
            # accumulator stays resident between K steps.
            grid=(nj, ni, nk),
            in_specs=[
                # x1 as matmul LHS: (tm, tk) blocks over the reduction axis.
                pl.BlockSpec((tm, tk), lambda j, i, k: (i, k)),
                # W in (out, in) layout: (tn, tk) blocks, independent of batch.
                pl.BlockSpec((tn, tk), lambda j, i, k: (j, k)),
                # x1 again, blocked like the output, for the gate blend
                # (constant across k -> DMA'd once per (i, j)).
                pl.BlockSpec((tm, tn), lambda j, i, k: (i, j)),
                # x2 blocked like the output.
                pl.BlockSpec((tm, tn), lambda j, i, k: (i, j)),
            ],
            out_specs=pl.BlockSpec((tm, tn), lambda j, i, k: (i, j)),
            scratch_shapes=[pltpu.VMEM((tm, tn), jnp.float32)],
        ),
        compiler_params=pltpu.CompilerParams(
            dimension_semantics=("parallel", "parallel", "arbitrary"),
            vmem_limit_bytes=32 * 1024 * 1024,
        ),
    )(x1, w, x1, x2)


def highway_ref(x1, x2, w):
    gate = _leaky_relu(x1 @ w.T + 1e-08)
    return _leaky_relu(gate * x2 + (1.0 - gate) * x1)


if __name__ == "__main__":
    key = jax.random.PRNGKey(0)
    k1, k2, k3, k4, k5, k6 = jax.random.split(key, 6)

    # --- small, TPU-aligned demo shape (single tile) ---
    batch, hidden = 8, 128
    x1 = jax.random.normal(k1, (batch, hidden), dtype=jnp.float32)
    x2 = jax.random.normal(k2, (batch, hidden), dtype=jnp.float32)
    bound = 1.0 / jnp.sqrt(hidden)
    w = jax.random.uniform(k3, (hidden, hidden), dtype=jnp.float32,
                           minval=-bound, maxval=bound)

    out = highway(x1, x2, w)
    jax.block_until_ready(out)
    ref = highway_ref(x1, x2, w)
    assert jnp.allclose(out, ref, atol=1e-5, rtol=1e-5), "f32 mismatch vs reference"

    # bf16-MXU path (f32 accumulate, f32 elementwise) — looser tolerance.
    out_bf16 = highway(x1, x2, w, mxu_bf16=True)
    jax.block_until_ready(out_bf16)
    assert jnp.allclose(out_bf16, ref, atol=5e-2, rtol=5e-2), "bf16-MXU mismatch"

    # --- multi-tile shape to exercise the grid + K accumulator path ---
    batch2, hidden2 = 16, 256
    x1b = jax.random.normal(k4, (batch2, hidden2), dtype=jnp.float32)
    x2b = jax.random.normal(k5, (batch2, hidden2), dtype=jnp.float32)
    bound2 = 1.0 / jnp.sqrt(hidden2)
    wb = jax.random.uniform(k6, (hidden2, hidden2), dtype=jnp.float32,
                            minval=-bound2, maxval=bound2)

    out_b = highway(x1b, x2b, wb, tm=8, tn=128, tk=128)  # grid (2, 2, 2)
    jax.block_until_ready(out_b)
    ref_b = highway_ref(x1b, x2b, wb)
    assert jnp.allclose(out_b, ref_b, atol=1e-5, rtol=1e-5), "tiled mismatch vs reference"

    print("KERNEL_OK")
</pallas_src>

<mosaic_0001>
module attributes {stable_mosaic.version = 11 : i64} {
  func.func @_highway_kernel(%arg0: i32, %arg1: i32, %arg2: i32, %arg3: memref<8x128xf32, #tpu.memory_space<vmem>>, %arg4: memref<128x128xf32, #tpu.memory_space<vmem>>, %arg5: memref<8x128xf32, #tpu.memory_space<vmem>>, %arg6: memref<8x128xf32, #tpu.memory_space<vmem>>, %arg7: memref<8x128xf32, #tpu.memory_space<vmem>>, %arg8: memref<8x128xf32, #tpu.memory_space<vmem>>) attributes {dimension_semantics = [#tpu.dimension_semantics<parallel>, #tpu.dimension_semantics<parallel>, #tpu.dimension_semantics<arbitrary>], iteration_bounds = array<i64: 1, 1, 1>, scalar_prefetch = 0 : i64, scratch_operands = 1 : i64, tpu.core_type = #tpu.core_type<tc>, window_params = [{transform_indices = @transform_0, window_bounds = array<i64: 8, 128>}, {transform_indices = @transform_1, window_bounds = array<i64: 128, 128>}, {transform_indices = @transform_2, window_bounds = array<i64: 8, 128>}, {transform_indices = @transform_3, window_bounds = array<i64: 8, 128>}, {transform_indices = @transform_4, window_bounds = array<i64: 8, 128>}]} {
    %c0_i32 = arith.constant 0 : i32
    %0 = arith.cmpi eq, %arg2, %c0_i32 : i32
    %1 = arith.extui %0 : i1 to i32
    %c0_i32_0 = arith.constant 0 : i32
    %2 = arith.cmpi ne, %1, %c0_i32_0 : i32
    scf.if %2 {
      %cst_10 = arith.constant 0.000000e+00 : f32
      %12 = vector.broadcast %cst_10 : f32 to vector<8x128xf32>
      %c0_11 = arith.constant 0 : index
      %c0_12 = arith.constant 0 : index
      %13 = vector.load %arg8[%c0_11, %c0_12] : memref<8x128xf32, #tpu.memory_space<vmem>>, vector<8x128xf32>
      tpu.vector_store %arg8[%c0_11, %c0_12], %12 {strides = array<i32>} : memref<8x128xf32, #tpu.memory_space<vmem>>, vector<8x128xf32>,
    } else {
    }
    %c0 = arith.constant 0 : index
    %c0_1 = arith.constant 0 : index
    %3 = vector.load %arg8[%c0, %c0_1] : memref<8x128xf32, #tpu.memory_space<vmem>>, vector<8x128xf32>
    %c0_2 = arith.constant 0 : index
    %c0_3 = arith.constant 0 : index
    %4 = vector.load %arg3[%c0_2, %c0_3] : memref<8x128xf32, #tpu.memory_space<vmem>>, vector<8x128xf32>
    %c0_4 = arith.constant 0 : index
    %c0_5 = arith.constant 0 : index
    %5 = vector.load %arg4[%c0_4, %c0_5] : memref<128x128xf32, #tpu.memory_space<vmem>>, vector<128x128xf32>
    %cst = arith.constant dense<0.000000e+00> : vector<8x128xf32>
    %6 = tpu.matmul %4, %5, %cst {dimension_numbers = #tpu.dot_dimension_numbers<[1], [1], [0], [0], [0, 0, 1, 0], [], []>} : vector<8x128xf32>, vector<128x128xf32>, vector<8x128xf32> -> vector<8x128xf32>
    %7 = arith.addf %3, %6 : vector<8x128xf32>
    %c0_6 = arith.constant 0 : index
    %c0_7 = arith.constant 0 : index
    %8 = vector.load %arg8[%c0_6, %c0_7] : memref<8x128xf32, #tpu.memory_space<vmem>>, vector<8x128xf32>
    tpu.vector_store %arg8[%c0_6, %c0_7], %7 {strides = array<i32>} : memref<8x128xf32, #tpu.memory_space<vmem>>, vector<8x128xf32>,
    %c0_i32_8 = arith.constant 0 : i32
    %9 = arith.cmpi eq, %arg2, %c0_i32_8 : i32
    %10 = arith.extui %9 : i1 to i32
    %c0_i32_9 = arith.constant 0 : i32
    %11 = arith.cmpi ne, %10, %c0_i32_9 : i32
    scf.if %11 {
      %c0_10 = arith.constant 0 : index
      %c0_11 = arith.constant 0 : index
      %12 = vector.load %arg5[%c0_10, %c0_11] : memref<8x128xf32, #tpu.memory_space<vmem>>, vector<8x128xf32>
      %c0_12 = arith.constant 0 : index
      %c0_13 = arith.constant 0 : index
      %13 = vector.load %arg6[%c0_12, %c0_13] : memref<8x128xf32, #tpu.memory_space<vmem>>, vector<8x128xf32>
      %c0_14 = arith.constant 0 : index
      %c0_15 = arith.constant 0 : index
      %14 = vector.load %arg8[%c0_14, %c0_15] : memref<8x128xf32, #tpu.memory_space<vmem>>, vector<8x128xf32>
      %cst_16 = arith.constant 9.99999993E-9 : f32
      %15 = vector.broadcast %cst_16 : f32 to vector<8x128xf32>
      %16 = arith.addf %14, %15 : vector<8x128xf32>
      %cst_17 = arith.constant 0.000000e+00 : f32
      %17 = vector.broadcast %cst_17 : f32 to vector<8x128xf32>
      %18 = arith.cmpf oge, %16, %17 : vector<8x128xf32>
      %cst_18 = arith.constant 0.00999999977 : f32
      %19 = vector.broadcast %cst_18 : f32 to vector<8x128xf32>
      %20 = arith.mulf %19, %16 : vector<8x128xf32>
      %21 = arith.select %18, %16, %20 : vector<8x128xi1>, vector<8x128xf32>
      %22 = arith.subf %13, %12 : vector<8x128xf32>
      %23 = arith.mulf %21, %22 : vector<8x128xf32>
      %24 = arith.addf %12, %23 : vector<8x128xf32>
      %cst_19 = arith.constant 0.000000e+00 : f32
      %25 = vector.broadcast %cst_19 : f32 to vector<8x128xf32>
      %26 = arith.cmpf oge, %24, %25 : vector<8x128xf32>
      %cst_20 = arith.constant 0.00999999977 : f32
      %27 = vector.broadcast %cst_20 : f32 to vector<8x128xf32>
      %28 = arith.mulf %27, %24 : vector<8x128xf32>
      %29 = arith.select %26, %24, %28 : vector<8x128xi1>, vector<8x128xf32>
      %c0_21 = arith.constant 0 : index
      %c0_22 = arith.constant 0 : index
      %30 = vector.load %arg7[%c0_21, %c0_22] : memref<8x128xf32, #tpu.memory_space<vmem>>, vector<8x128xf32>
      tpu.vector_store %arg7[%c0_21, %c0_22], %29 {strides = array<i32>} : memref<8x128xf32, #tpu.memory_space<vmem>>, vector<8x128xf32>,
    } else {
    }
    return
  }
  func.func @transform_0(%arg0: i32, %arg1: i32, %arg2: i32) -> (i32, i32) {
    %c0_i32 = arith.constant 0 : i32
    return %arg1, %arg2 : i32, i32
  }
  func.func @transform_1(%arg0: i32, %arg1: i32, %arg2: i32) -> (i32, i32) {
    %c0_i32 = arith.constant 0 : i32
    return %arg0, %arg2 : i32, i32
  }
  func.func @transform_2(%arg0: i32, %arg1: i32, %arg2: i32) -> (i32, i32) {
    %c0_i32 = arith.constant 0 : i32
    return %arg1, %arg0 : i32, i32
  }
  func.func @transform_3(%arg0: i32, %arg1: i32, %arg2: i32) -> (i32, i32) {
    %c0_i32 = arith.constant 0 : i32
    return %arg1, %arg0 : i32, i32
  }
  func.func @transform_4(%arg0: i32, %arg1: i32, %arg2: i32) -> (i32, i32) {
    %c0_i32 = arith.constant 0 : i32
    return %arg1, %arg0 : i32, i32
  }
}

</mosaic_0001>

<bundles_post_ra>
// kernel: tpu_custom_call.1
= control target key start
LH: loop header
LB: loop body
LE: loop exit
PB: predicated region body
PF: predicated region fallthrough
CT: control target
= control target key end

     0   :  { %9 = vsyncpa [#allocation4], 0  ;;  %s447_s0 = inlined_call_operand.hbm [shape: f32[8,128], index: 0, kind: input, shape index: {}]   ;;  %s448_s1 = inlined_call_operand.hbm [shape: f32[128,128], index: 1, kind: input, shape index: {}]   ;;  %s449_s2 = inlined_call_operand.hbm [shape: f32[8,128], index: 2, kind: input, shape index: {}]   ;;  %s450_s3 = inlined_call_operand.vmem [shape: f32[8,128], index: 3, kind: input, shape index: {}]   ;;  %s451_s4 = inlined_call_operand.hbm [shape: f32[8,128], index: 4, kind: output, shape index: {}]  }
   0x1   :  { %10 = vsyncpa [#allocation7], 0 }
   0x2   :  { %11 = vsyncpa [#allocation5], 0  ;;  %s362_s15 = smov [#allocation6]   ;;  %s268_s19 = scalar_lea.hbm %s448_s1, 2048 }
   0x3   :  { %s27_s16 = sshll.u32 %s362_s15, 4  ;;  %p269_p0 = scmp.ne.s32.totalorder %s448_s1, %s268_s19  ;;  %s28_s16 = int_to_ptr.vmem [resolvable:$true] %s27_s16 }
   0x4   :  { %p272_p1 = scmp.lt.u32.totalorder %s268_s19, %s448_s1 }
   0x6   :  { %p274_p2 = pnand %p272_p1, %p269_p0 }
   0x8   :  { %277 = shalt.err (!%p274_p2)
}
   0x9   :  { %s278_s24 = scalar_lea.vmem %s28_s16, 2048  ;;  %p283_p4 = scmp.lt.s32.totalorder %s28_s16, %s28_s16 }
   0xa   :  { %p279_p3 = scmp.ne.s32.totalorder %s28_s16, %s278_s24  ;;  %p284_p5 = scmp.lt.s32.totalorder %s278_s24, %s278_s24 }
   0xc   :  { %p285_p6 = por %p284_p5, %p283_p4 }
   0xe   :  { %p286_p7 = pnand %p285_p6, %p279_p3 }
  0x10   :  { %289 = shalt.err (!%p286_p7)
}
  0x11   :  { %s363_s25 = smov 128   ;;  %s364_s26 = smov 8  }
  0x12   :  { %33 = dma.hbm_to_vmem [thread:$0]  %s448_s1, 2048, %s28_s16, [#allocation7], %s363_s25, %s363_s25, %s364_s26  }
  0x13   :  { %s365_s29 = smov [#allocation3]   ;;  %s366_s5 = smov [#allocation8]  }
  0x14   :  { %s18_s30 = sshll.u32 %s365_s29, 4  ;;  %s40_s6 = sshll.u32 %s366_s5, 4  ;;  %s19_s30 = int_to_ptr.vmem [resolvable:$true] %s18_s30  ;;  %s41_s6 = int_to_ptr.vmem [resolvable:$true] %s40_s6 }
  0x15   :  { %s290_s9 = scalar_lea.hbm %s447_s0, 128 }
  0x16   :  { %p291_p8 = scmp.ne.s32.totalorder %s447_s0, %s290_s9  ;;  %p294_p9 = scmp.lt.u32.totalorder %s290_s9, %s447_s0 }
  0x18   :  { %p296_p10 = pnand %p294_p9, %p291_p8 }
  0x1a   :  { %299 = shalt.err (!%p296_p10)
}
  0x1b   :  { %s300_s1 = scalar_lea.vmem %s19_s30, 128  ;;  %p305_p12 = scmp.lt.s32.totalorder %s19_s30, %s19_s30 }
  0x1c   :  { %p301_p11 = scmp.ne.s32.totalorder %s19_s30, %s300_s1  ;;  %p306_p13 = scmp.lt.s32.totalorder %s300_s1, %s300_s1 }
  0x1e   :  { %p307_p0 = por %p306_p13, %p305_p12 }
  0x20   :  { %p308_p1 = pnand %p307_p0, %p301_p11 }
  0x22   :  { %311 = shalt.err (!%p308_p1)
}
  0x23   :  { %21 = dma.hbm_to_vmem [thread:$0]  %s447_s0, 128, %s19_s30, [#allocation4]  }
  0x24   :  { %s312_s18 = scalar_lea.hbm %s449_s2, 128 }
  0x25   :  { %p313_p2 = scmp.ne.s32.totalorder %s449_s2, %s312_s18  ;;  %p316_p3 = scmp.lt.u32.totalorder %s312_s18, %s449_s2 }
  0x27   :  { %p318_p4 = pnand %p316_p3, %p313_p2 }
  0x29   :  { %321 = shalt.err (!%p318_p4)
}
  0x2a   :  { %s322_s23 = scalar_lea.vmem %s41_s6, 128  ;;  %p327_p6 = scmp.lt.s32.totalorder %s41_s6, %s41_s6 }
  0x2b   :  { %p323_p5 = scmp.ne.s32.totalorder %s41_s6, %s322_s23  ;;  %p328_p7 = scmp.lt.s32.totalorder %s322_s23, %s322_s23 }
  0x2d   :  { %p329_p8 = por %p328_p7, %p327_p6 }
  0x2f   :  { %p330_p9 = pnand %p329_p8, %p323_p5 }
  0x31   :  { %333 = shalt.err (!%p330_p9)
}
  0x32   :  { %43 = dma.hbm_to_vmem [thread:$0]  %s449_s2, 128, %s41_s6, [#allocation7]  }
  0x33   :  { %356 = dma.done.wait [#allocation4], 128  }
  0x34   :  { %357 = vsyncadd [#allocation4], 4294967168 }
  0x35   :  { %358 = dma.done.wait [#allocation7], 2176  }
  0x36   :  { %359 = vsyncadd [#allocation7], 4294965120  ;;  %v367_v0 = vmov 0.0|0.0   ;;  %vm368_vm0 = vmmov 0   ;;  %v369_v1 = vmov 0.0   ;;  %v62_v2 = vld [vmem:[#allocation6] sm:$0xff] }
  0x37   :  { %235 = vmatprep.subr.bf16.mxu0 %v367_v0  ;;  %232 = vmatprep.mubr.msk.f32.mxu0 %vm368_vm0, %v369_v1  ;;  %v63_v3 = vld [vmem:[#allocation6 + $0x8] sm:$0xff]  ;;  %v64_v5 = vld [vmem:[#allocation6 + $0x10] sm:$0xff]  ;;  %v65_v6 = vld [vmem:[#allocation6 + $0x18] sm:$0xff]  ;;  %s370_s26 = smov [#allocation9]  }
  0x38   :  { %v236_v4 = vpack.c.bf16 %v63_v3, %v62_v2  ;;  %v239_v7 = vpack.c.bf16 %v65_v6, %v64_v5  ;;  %v66_v8 = vld [vmem:[#allocation6 + $0x20] sm:$0xff]  ;;  %v67_v9 = vld [vmem:[#allocation6 + $0x28] sm:$0xff]  ;;  %v68_v11 = vld [vmem:[#allocation6 + $0x30] sm:$0xff]  ;;  %s173_s27 = sshll.u32 %s370_s26, 4  ;;  %s174_s27 = int_to_ptr.vmem [resolvable:$true] %s173_s27 }
  0x39   :  { %v242_v10 = vpack.c.bf16 %v67_v9, %v66_v8  ;;  %v69_v12 = vld [vmem:[#allocation6 + $0x38] sm:$0xff]  ;;  %v70_v14 = vld [vmem:[#allocation6 + $0x40] sm:$0xff]  ;;  %v71_v15 = vld [vmem:[#allocation6 + $0x48] sm:$0xff]  ;;  %s334_s28 = scalar_lea.vmem %s174_s27, 128  ;;  %p339_p11 = scmp.lt.s32.totalorder %s174_s27, %s174_s27 }
  0x3a   :  { %237 = vmatpush3.bf16.xpose.msra.mxu0 %v236_v4  ;;  %v245_v13 = vpack.c.bf16 %v69_v12, %v68_v11  ;;  %v248_v16 = vpack.c.bf16 %v71_v15, %v70_v14  ;;  %v72_v17 = vld [vmem:[#allocation6 + $0x50] sm:$0xff]  ;;  %v73_v18 = vld [vmem:[#allocation6 + $0x58] sm:$0xff]  ;;  %v74_v20 = vld [vmem:[#allocation6 + $0x60] sm:$0xff]  ;;  %p335_p10 = scmp.ne.s32.totalorder %s174_s27, %s334_s28  ;;  %p340_p12 = scmp.lt.s32.totalorder %s334_s28, %s334_s28 }
  0x3b   :  { %238 = vmatprep.subr.bf16.mxu0 %v367_v0  ;;  %v251_v19 = vpack.c.bf16 %v73_v18, %v72_v17  ;;  %v75_v21 = vld [vmem:[#allocation6 + $0x68] sm:$0xff]  ;;  %v76_v23 = vld [vmem:[#allocation6 + $0x70] sm:$0xff]  ;;  %v77_v24 = vld [vmem:[#allocation6 + $0x78] sm:$0xff] }
  0x3c   :  { %v254_v22 = vpack.c.bf16 %v75_v21, %v74_v20  ;;  %v257_v25 = vpack.c.bf16 %v77_v24, %v76_v23  ;;  %v61_v26 = vld [vmem:[#allocation3] sm:$0xff]  ;;  %v153_v27 = vld [vmem:[#allocation8] sm:$0xff]  ;;  %p341_p13 = por %p340_p12, %p339_p11 }
  0x3d   :  { %v154_v28 = vld [vmem:[%s450_s3] sm:$0xff] }
  0x3e   :  { %v160_v32 = vsub.f32 %v154_v28, %v153_v27  ;;  %p342_p0 = pnand %p341_p13, %p335_p10 }
  0x42   :  { %240 = vmatpush3.bf16.xpose.msra.mxu0 %v239_v7 }
  0x43   :  { %241 = vmatprep.subr.bf16.mxu0 %v367_v0 }
  0x4a   :  { %243 = vmatpush3.bf16.xpose.msra.mxu0 %v242_v10 }
  0x4b   :  { %244 = vmatprep.subr.bf16.mxu0 %v367_v0 }
  0x52   :  { %246 = vmatpush3.bf16.xpose.msra.mxu0 %v245_v13 }
  0x53   :  { %247 = vmatprep.subr.bf16.mxu0 %v367_v0 }
  0x5a   :  { %249 = vmatpush3.bf16.xpose.msra.mxu0 %v248_v16 }
  0x5b   :  { %250 = vmatprep.subr.bf16.mxu0 %v367_v0 }
  0x62   :  { %252 = vmatpush3.bf16.xpose.msra.mxu0 %v251_v19 }
  0x63   :  { %253 = vmatprep.subr.bf16.mxu0 %v367_v0 }
  0x6a   :  { %255 = vmatpush3.bf16.xpose.msra.mxu0 %v254_v22 }
  0x6b   :  { %256 = vmatprep.subr.bf16.mxu0 %v367_v0 }
  0x72   :  { %258 = vmatpush3.bf16.xpose.msra.mxu0 %v257_v25 }
  0x79   :  { %233 = vmatmul.mubr.f32.vlgmr.msra.gmra.mrb[0].mxu0 %v61_v26 }
 0x14c   :  { %v144_v29 = vpop.f32.mrb[0].mxu0 }
 0x14d   :  { %v156_v30 = vadd.f32 1e-08, %v144_v29  ;;  %v234_v31 = vpop.f32.mrb[1].mxu0 }
 0x14f   :  { %vm157_vm1 = vcmp.ge.f32.partialorder %v156_v30, 0.0  ;;  %v158_v33 = vmul.f32 0.01, %v156_v30 }
 0x151   :  { %v159_v34 = vsel %vm157_vm1, %v156_v30, %v158_v33 }
 0x152   :  { %v161_v35 = vmul.f32 %v160_v32, %v159_v34 }
 0x154   :  { %v162_v36 = vadd.f32 %v161_v35, %v153_v27 }
 0x156   :  { %vm163_vm2 = vcmp.ge.f32.partialorder %v162_v36, 0.0  ;;  %v164_v37 = vmul.f32 0.01, %v162_v36 }
 0x158   :  { %v165_v38 = vsel %vm163_vm2, %v162_v36, %v164_v37 }
 0x159   :  { %166 = vst [vmem:[#allocation9] sm:$0xff] %v165_v38 }
 0x15a   :  { %345 = shalt.err (!%p342_p0)
}
 0x15b   :  { %s346_s30 = scalar_lea.hbm %s451_s4, 128 }
 0x15c   :  { %p347_p1 = scmp.ne.s32.totalorder %s451_s4, %s346_s30  ;;  %p350_p2 = scmp.lt.u32.totalorder %s346_s30, %s451_s4 }
 0x15e   :  { %p352_p3 = pnand %p350_p2, %p347_p1 }
 0x160   :  { %355 = shalt.err (!%p352_p3)
}
 0x161   :  { %176 = dma.vmem_to_hbm [thread:$0]  %s174_s27, 128, %s451_s4, [#allocation5]  }
 0x162   :  { %360 = dma.done.wait [#allocation5], 128  }
 0x163   :  { %361 = vsyncadd [#allocation5], 4294967168 }
 0x164   :  { %180 = vsyncpa [#allocation4], 1 }
 0x165   :  { %181 = vsyncpa [#allocation7], 1 }
 0x166   :  { %182 = vsyncpa [#allocation5], 1 }

</bundles_post_ra>
